<compile_context>
chip_gen: v5e
topology: v5e:2x2
jax: 0.10.0
libtpu: 0.0.40
codegen_flags: <defaults>
</compile_context>

<pallas_src>
import math
import functools

import jax
import jax.numpy as jnp
from jax import lax
from jax.experimental import pallas as pl
from jax.experimental.pallas import tpu as pltpu

# ----------------------------- config (small, shape-consistent with the module) ----------
HIDDEN = 128         # stands in for 768; multiple of 128 => lane-dense stores
NUM_HEADS = 4
HEAD_DIM = HIDDEN // NUM_HEADS          # 32
INTERMEDIATE = 4 * HIDDEN               # BERT ratio (stands in for 3072)
VOCAB = 128
MAX_POS = 32
NUM_LAYERS = 2
LN_EPS = 1e-12
PAD = 0
NEG_INF = -1e30

_ACT_DTYPE = jnp.bfloat16               # inter-layer activation dtype in HBM

_COMPILER_PARAMS = pltpu.CompilerParams(
    dimension_semantics=("parallel",),
    vmem_limit_bytes=32 * 1024 * 1024,
)


# ----------------------------- BlockSpec helpers -----------------------------------------
def _rep_spec(shape):
    """Block replicated across the (single) grid axis (weights / biases / shared tables).
    TODO(synk): at real sizes pass pipeline_mode=pl.Buffered(1) here (constant block index
    across the grid => no benefit from double-buffering, halves weight VMEM on v7x)."""
    nd = len(shape)
    return pl.BlockSpec(shape, lambda b, _nd=nd: (0,) * _nd)


def _pick_batch_tile(B, S):
    """Largest divisor of B with Bt*S <= ~128 rows: fills the MXU M axis at small S while
    degrading to Bt=1 (grid=(B,), megacore-parallel) once S itself is >= 128 rows."""
    target = max(1, -(-128 // S))
    bt = 1
    for d in range(1, B + 1):
        if B % d == 0 and d <= target:
            bt = d
    return bt


# ----------------------------- in-kernel helpers ------------------------------------------
def _layernorm_f32(y, g, b, eps):
    mean = jnp.mean(y, axis=-1, keepdims=True)
    var = jnp.mean(jnp.square(y - mean), axis=-1, keepdims=True)
    return (y - mean) * lax.rsqrt(var + eps) * g + b


def _attn_rows(q, k, v, wo, nh, dh, mask=None):
    """Multi-head attention for one batch row with the output projection folded into the
    head loop (no lane-axis concat of head outputs; head contributions accumulate in f32).

    q: [Sq, H] f32 (scale already folded in), k/v: [Sk, H] f32, wo: [H, H] bf16.
    Returns sum_h softmax(q_h k_h^T [+mask]) v_h @ wo[h*dh:(h+1)*dh, :]  -> [Sq, H] f32.
    """
    out = None
    for h in range(nh):
        hs = slice(h * dh, (h + 1) * dh)
        qh = q[:, hs].astype(jnp.bfloat16)
        kh = k[:, hs].astype(jnp.bfloat16)
        vh = v[:, hs].astype(jnp.bfloat16)
        # q @ k^T via dot_general (contract last dims) — no explicit transpose.
        s = lax.dot_general(qh, kh, (((1,), (1,)), ((), ())),
                            preferred_element_type=jnp.float32)      # [Sq, Sk] f32
        if mask is not None:
            s = jnp.where(mask, s, NEG_INF)                          # select, no additive slab
        s = s - jnp.max(s, axis=-1, keepdims=True)
        p = jnp.exp(s)
        p = p * pl.reciprocal(jnp.sum(p, axis=-1, keepdims=True), approx=True)
        ctx = jnp.dot(p.astype(jnp.bfloat16), vh,
                      preferred_element_type=jnp.float32)            # [Sq, dh]
        contrib = jnp.dot(ctx.astype(jnp.bfloat16), wo[hs, :],
                          preferred_element_type=jnp.float32)        # [Sq, H]
        out = contrib if out is None else out + contrib
    return out


# ----------------------------- Pallas kernels ---------------------------------------------
def _embed_ln_kernel(w_ref, p_ref, g_ref, b_ref, o_ref, *, eps):
    # pos table [S,H] broadcast over batch in-kernel (never B-copied in HBM)
    x = w_ref[...] + p_ref[...][None, :, :]
    y = _layernorm_f32(x, g_ref[...], b_ref[...], eps)
    o_ref[...] = y.astype(o_ref.dtype)


def _layer_kernel(x_ref, img_ref,
                  wqkv_ref, bqkv_ref, wao_ref, bao_ref, g1_ref, b1_ref,
                  wcq_ref, bcq_ref, wckv_ref, bckv_ref, wco_ref, bco_ref, gc_ref, bc_ref,
                  wfi_ref, bfi_ref, wfo_ref, bfo_ref, g2_ref, b2_ref,
                  o_ref, *, nh, dh, scale, eps):
    Bt, S, H = x_ref.shape

    x_bf = x_ref[...].reshape(Bt * S, H)               # bf16 MXU operand
    x = x_bf.astype(jnp.float32)                       # residual/LN math in f32

    # causal mask generated in-kernel, shared across batch elements and heads
    rows = lax.broadcasted_iota(jnp.int32, (S, S), 0)
    cols = lax.broadcasted_iota(jnp.int32, (S, S), 1)
    causal = cols <= rows

    wao = wao_ref[...]
    wco = wco_ref[...]

    # ---- 1) self-attention (fused QKV over Bt*S rows) ------------------------------------
    qkv = jnp.dot(x_bf, wqkv_ref[...],
                  preferred_element_type=jnp.float32) + bqkv_ref[...]    # [Bt*S, 3H]
    attn_parts = []
    for b in range(Bt):
        rs = slice(b * S, (b + 1) * S)
        q = qkv[rs, 0:H] * scale                      # fold 1/sqrt(dh) into q
        k = qkv[rs, H:2 * H]
        v = qkv[rs, 2 * H:3 * H]
        attn_parts.append(_attn_rows(q, k, v, wao, nh, dh, mask=causal))
    attn = attn_parts[0] if Bt == 1 else jnp.concatenate(attn_parts, axis=0)
    h1 = _layernorm_f32(attn + bao_ref[...] + x, g1_ref[...], b1_ref[...], eps)

    # ---- 2) cross-attention on img_feat (no mask) -----------------------------------------
    q_all = (jnp.dot(h1.astype(jnp.bfloat16), wcq_ref[...],
                     preferred_element_type=jnp.float32) + bcq_ref[...]) * scale
    cross_parts = []
    for b in range(Bt):
        kv = jnp.dot(img_ref[b], wckv_ref[...],
                     preferred_element_type=jnp.float32) + bckv_ref[...]  # [L, 2H]
        k = kv[:, 0:H]
        v = kv[:, H:2 * H]
        q = q_all[b * S:(b + 1) * S]
        cross_parts.append(_attn_rows(q, k, v, wco, nh, dh, mask=None))
    cross = cross_parts[0] if Bt == 1 else jnp.concatenate(cross_parts, axis=0)
    h2 = _layernorm_f32(cross + bco_ref[...] + h1, gc_ref[...], bc_ref[...], eps)

    # ---- 3) FFN over Bt*S rows --------------------------------------------------------------
    t = jnp.dot(h2.astype(jnp.bfloat16), wfi_ref[...],
                preferred_element_type=jnp.float32) + bfi_ref[...]       # [Bt*S, I]
    # TODO(synk): HF BERT uses exact erf-gelu; tanh-approx kept for guaranteed Mosaic lowering.
    t = jax.nn.gelu(t, approximate=True)
    ffn = jnp.dot(t.astype(jnp.bfloat16), wfo_ref[...],
                  preferred_element_type=jnp.float32) + bfo_ref[...]     # [Bt*S, H]
    y = _layernorm_f32(ffn + h2, g2_ref[...], b2_ref[...], eps)

    o_ref[...] = y.reshape(Bt, S, H).astype(o_ref.dtype)


def _cls_head_kernel(x_ref, wt_ref, bt_ref, g_ref, bln_ref, wd_ref, bd_ref, o_ref, *, eps):
    x = x_ref[...]                                                       # [tm, H] bf16
    t = jnp.dot(x, wt_ref[...], preferred_element_type=jnp.float32) + bt_ref[...]
    t = jax.nn.gelu(t, approximate=True)
    t = _layernorm_f32(t, g_ref[...], bln_ref[...], eps)
    logits = jnp.dot(t.astype(jnp.bfloat16), wd_ref[...],
                     preferred_element_type=jnp.float32) + bd_ref[...]   # [tm, V] lane-dense
    o_ref[...] = logits


# ----------------------------- wrappers (pallas_call) --------------------------------------
def embed_layernorm(word, pos, gamma, beta):
    B, S, H = word.shape
    bt = _pick_batch_tile(B, S)
    return pl.pallas_call(
        functools.partial(_embed_ln_kernel, eps=LN_EPS),
        grid=(B // bt,),
        in_specs=[pl.BlockSpec((bt, S, H), lambda i: (i, 0, 0)),
                  _rep_spec((S, H)), _rep_spec((1, H)), _rep_spec((1, H))],
        out_specs=pl.BlockSpec((bt, S, H), lambda i: (i, 0, 0)),
        out_shape=jax.ShapeDtypeStruct((B, S, H), _ACT_DTYPE),
        compiler_params=_COMPILER_PARAMS,
    )(word, pos, gamma, beta)


def transformer_layer(x, img, lyr):
    """One fused kernel per layer: self-attn + cross-attn + FFN, activation stays in VMEM."""
    B, S, H = x.shape
    L = img.shape[1]
    bt = _pick_batch_tile(B, S)
    scale = 1.0 / math.sqrt(HEAD_DIM)
    kernel = functools.partial(_layer_kernel, nh=NUM_HEADS, dh=HEAD_DIM,
                               scale=scale, eps=LN_EPS)
    in_specs = [
        pl.BlockSpec((bt, S, H), lambda i: (i, 0, 0)),     # x
        pl.BlockSpec((bt, L, H), lambda i: (i, 0, 0)),     # img_feat
        _rep_spec((H, 3 * H)), _rep_spec((1, 3 * H)),      # fused qkv
        _rep_spec((H, H)), _rep_spec((1, H)),              # attn out proj
        _rep_spec((1, H)), _rep_spec((1, H)),              # LN1
        _rep_spec((H, H)), _rep_spec((1, H)),              # cross q
        _rep_spec((H, 2 * H)), _rep_spec((1, 2 * H)),      # fused cross kv
        _rep_spec((H, H)), _rep_spec((1, H)),              # cross out proj
        _rep_spec((1, H)), _rep_spec((1, H)),              # LN cross
        _rep_spec((H, INTERMEDIATE)), _rep_spec((1, INTERMEDIATE)),   # ffn in
        _rep_spec((INTERMEDIATE, H)), _rep_spec((1, H)),   # ffn out
        _rep_spec((1, H)), _rep_spec((1, H)),              # LN2
    ]
    return pl.pallas_call(
        kernel,
        grid=(B // bt,),
        in_specs=in_specs,
        out_specs=pl.BlockSpec((bt, S, H), lambda i: (i, 0, 0)),
        out_shape=jax.ShapeDtypeStruct((B, S, H), _ACT_DTYPE),
        compiler_params=_COMPILER_PARAMS,
    )(x, img,
      lyr["qkv_w"], lyr["qkv_b"], lyr["ao_w"], lyr["ao_b"], lyr["ln1_g"], lyr["ln1_b"],
      lyr["cq_w"], lyr["cq_b"], lyr["ckv_w"], lyr["ckv_b"], lyr["co_w"], lyr["co_b"],
      lyr["lnc_g"], lyr["lnc_b"],
      lyr["fi_w"], lyr["fi_b"], lyr["fo_w"], lyr["fo_b"], lyr["ln2_g"], lyr["ln2_b"])


def cls_head(h2, params):
    # TODO(synk): at real vocab (30522) tile the decoder matmul over the vocab axis
    # (tv a multiple of 128, padded vocab) so cls_dec_w never has to sit whole in VMEM.
    M, H = h2.shape
    V = VOCAB
    tm = 8 if (M % 8 == 0 and M >= 16) else M      # >=2 parallel grid steps in train mode
    return pl.pallas_call(
        functools.partial(_cls_head_kernel, eps=LN_EPS),
        grid=(M // tm,),
        in_specs=[pl.BlockSpec((tm, H), lambda i: (i, 0)),
                  _rep_spec((H, H)), _rep_spec((1, H)),
                  _rep_spec((1, H)), _rep_spec((1, H)),
                  _rep_spec((H, V)), _rep_spec((1, V))],
        out_specs=pl.BlockSpec((tm, V), lambda i: (i, 0)),
        out_shape=jax.ShapeDtypeStruct((M, V), jnp.float32),
        compiler_params=_COMPILER_PARAMS,
    )(h2, params["cls_tr_w"], params["cls_tr_b"],
      params["cls_ln_g"], params["cls_ln_b"],
      params["cls_dec_w"], params["cls_dec_b"])


# ----------------------------- parameter construction --------------------------------------
def _dense_w(key, fan_in, fan_out, std=0.02):
    # Weights stored bf16 (MXU operand dtype, halves weight DMA); biases / LN stay f32.
    return (jax.random.normal(key, (fan_in, fan_out), jnp.float32) * std).astype(jnp.bfloat16)


def _bias(n):
    return jnp.zeros((1, n), jnp.float32)


def init_params(key):
    keys = iter(jax.random.split(key, 64))
    p = {}
    word = jax.random.normal(next(keys), (VOCAB, HIDDEN), jnp.float32) * 0.02
    p["word_emb"] = word.at[PAD].set(0.0)          # padding_idx=PAD
    p["pos_emb"] = jax.random.normal(next(keys), (MAX_POS, HIDDEN), jnp.float32) * 0.02
    p["emb_ln_g"] = jnp.ones((1, HIDDEN), jnp.float32)
    p["emb_ln_b"] = jnp.zeros((1, HIDDEN), jnp.float32)

    layers = []
    for _ in range(NUM_LAYERS):
        lyr = {}
        lyr["qkv_w"] = _dense_w(next(keys), HIDDEN, 3 * HIDDEN)     # fused q|k|v
        lyr["qkv_b"] = _bias(3 * HIDDEN)
        lyr["ao_w"] = _dense_w(next(keys), HIDDEN, HIDDEN)
        lyr["ao_b"] = _bias(HIDDEN)
        lyr["cq_w"] = _dense_w(next(keys), HIDDEN, HIDDEN)
        lyr["cq_b"] = _bias(HIDDEN)
        lyr["ckv_w"] = _dense_w(next(keys), HIDDEN, 2 * HIDDEN)     # fused cross k|v
        lyr["ckv_b"] = _bias(2 * HIDDEN)
        lyr["co_w"] = _dense_w(next(keys), HIDDEN, HIDDEN)
        lyr["co_b"] = _bias(HIDDEN)
        lyr["fi_w"] = _dense_w(next(keys), HIDDEN, INTERMEDIATE)
        lyr["fi_b"] = _bias(INTERMEDIATE)
        lyr["fo_w"] = _dense_w(next(keys), INTERMEDIATE, HIDDEN)
        lyr["fo_b"] = _bias(HIDDEN)
        for ln in ("ln1", "lnc", "ln2"):
            lyr[ln + "_g"] = jnp.ones((1, HIDDEN), jnp.float32)
            lyr[ln + "_b"] = jnp.zeros((1, HIDDEN), jnp.float32)
        layers.append(lyr)
    p["layers"] = layers

    p["cls_tr_w"] = _dense_w(next(keys), HIDDEN, HIDDEN)
    p["cls_tr_b"] = _bias(HIDDEN)
    p["cls_ln_g"] = jnp.ones((1, HIDDEN), jnp.float32)
    p["cls_ln_b"] = jnp.zeros((1, HIDDEN), jnp.float32)
    p["cls_dec_w"] = _dense_w(next(keys), HIDDEN, VOCAB)
    p["cls_dec_b"] = _bias(VOCAB)
    return p


# ----------------------------- forward pass ------------------------------------------------
def qa_decoder_forward(params, img_feat, token_ids, eval_flag=False):
    B, S = token_ids.shape
    H = HIDDEN

    # TODO(synk): word-embedding gather kept in plain JAX glue; at real sizes fuse via
    # PrefetchScalarGridSpec + pl.Element row gather.
    word = jnp.take(params["word_emb"], token_ids, axis=0)            # [B,S,H] f32
    pos = params["pos_emb"][:S]                                       # [S,H] — no B-broadcast in HBM
    x = embed_layernorm(word, pos, params["emb_ln_g"], params["emb_ln_b"])  # bf16 [B,S,H]

    img_bf = img_feat.astype(jnp.bfloat16)                            # halve img_feat DMA
    for lyr in params["layers"]:
        x = transformer_layer(x, img_bf, lyr)                         # ONE fused kernel / layer

    hidden = x[:, -1:, :] if eval_flag else x                         # last token only in eval
    Bh, Sh, _ = hidden.shape
    logits = cls_head(hidden.reshape(Bh * Sh, H), params)
    return logits.reshape(Bh, Sh, VOCAB)


# ----------------------------- main ---------------------------------------------------------
if __name__ == "__main__":
    key = jax.random.PRNGKey(0)
    k_par, k_tok, k_img = jax.random.split(key, 3)

    params = init_params(k_par)

    B, S, L_IMG = 2, 8, 6
    token_ids = jax.random.randint(k_tok, (B, S), 1, VOCAB, dtype=jnp.int32)
    img_feat = jax.random.normal(k_img, (B, L_IMG, HIDDEN), jnp.float32)

    preds = qa_decoder_forward(params, img_feat, token_ids, eval_flag=False)
    preds = jax.block_until_ready(preds)
    assert preds.shape == (B, S, VOCAB)

    preds_eval = qa_decoder_forward(params, img_feat, token_ids, eval_flag=True)
    preds_eval = jax.block_until_ready(preds_eval)
    assert preds_eval.shape == (B, 1, VOCAB)

    print("KERNEL_OK")
</pallas_src>

<mosaic_0001>
module attributes {stable_mosaic.version = 11 : i64} {
  func.func @_embed_ln_kernel(%arg0: i32, %arg1: memref<2x8x128xf32, #tpu.memory_space<vmem>>, %arg2: memref<8x128xf32, #tpu.memory_space<vmem>>, %arg3: memref<1x128xf32, #tpu.memory_space<vmem>>, %arg4: memref<1x128xf32, #tpu.memory_space<vmem>>, %arg5: memref<2x8x128xbf16, #tpu.memory_space<vmem>>) attributes {dimension_semantics = [#tpu.dimension_semantics<parallel>], iteration_bounds = array<i64: 1>, scalar_prefetch = 0 : i64, scratch_operands = 0 : i64, tpu.core_type = #tpu.core_type<tc>, window_params = [{transform_indices = @transform_0, window_bounds = array<i64: 2, 8, 128>}, {pipeline_mode = #tpu.pipeline_mode<synchronous>, transform_indices = @transform_1, window_bounds = array<i64: 8, 128>}, {pipeline_mode = #tpu.pipeline_mode<synchronous>, transform_indices = @transform_2, window_bounds = array<i64: 1, 128>}, {pipeline_mode = #tpu.pipeline_mode<synchronous>, transform_indices = @transform_3, window_bounds = array<i64: 1, 128>}, {transform_indices = @transform_4, window_bounds = array<i64: 2, 8, 128>}]} {
    %c0 = arith.constant 0 : index
    %c0_0 = arith.constant 0 : index
    %c0_1 = arith.constant 0 : index
    %0 = vector.load %arg1[%c0, %c0_0, %c0_1] : memref<2x8x128xf32, #tpu.memory_space<vmem>>, vector<2x8x128xf32>
    %c0_2 = arith.constant 0 : index
    %c0_3 = arith.constant 0 : index
    %1 = vector.load %arg2[%c0_2, %c0_3] : memref<8x128xf32, #tpu.memory_space<vmem>>, vector<8x128xf32>
    %2 = vector.shape_cast %1 : vector<8x128xf32> to vector<1x8x128xf32>
    %3 = vector.broadcast %2 : vector<1x8x128xf32> to vector<2x8x128xf32>
    %4 = arith.addf %0, %3 : vector<2x8x128xf32>
    %c0_4 = arith.constant 0 : index
    %c0_5 = arith.constant 0 : index
    %5 = vector.load %arg3[%c0_4, %c0_5] : memref<1x128xf32, #tpu.memory_space<vmem>>, vector<1x128xf32>
    %c0_6 = arith.constant 0 : index
    %c0_7 = arith.constant 0 : index
    %6 = vector.load %arg4[%c0_6, %c0_7] : memref<1x128xf32, #tpu.memory_space<vmem>>, vector<1x128xf32>
    %cst = arith.constant dense<0.000000e+00> : vector<2x8xf32>
    %7 = vector.multi_reduction <add>, %4, %cst [2] : vector<2x8x128xf32> to vector<2x8xf32>
    %8 = vector.shape_cast %7 : vector<2x8xf32> to vector<2x8x1xf32>
    %cst_8 = arith.constant 1.280000e+02 : f32
    %9 = vector.broadcast %cst_8 : f32 to vector<2x8x1xf32>
    %10 = arith.divf %8, %9 : vector<2x8x1xf32>
    %11 = vector.broadcast %10 : vector<2x8x1xf32> to vector<2x8x128xf32>
    %12 = arith.subf %4, %11 : vector<2x8x128xf32>
    %13 = arith.mulf %12, %12 : vector<2x8x128xf32>
    %cst_9 = arith.constant dense<0.000000e+00> : vector<2x8xf32>
    %14 = vector.multi_reduction <add>, %13, %cst_9 [2] : vector<2x8x128xf32> to vector<2x8xf32>
    %15 = vector.shape_cast %14 : vector<2x8xf32> to vector<2x8x1xf32>
    %cst_10 = arith.constant 1.280000e+02 : f32
    %16 = vector.broadcast %cst_10 : f32 to vector<2x8x1xf32>
    %17 = arith.divf %15, %16 : vector<2x8x1xf32>
    %18 = vector.broadcast %10 : vector<2x8x1xf32> to vector<2x8x128xf32>
    %19 = arith.subf %4, %18 : vector<2x8x128xf32>
    %cst_11 = arith.constant 9.99999996E-13 : f32
    %20 = vector.broadcast %cst_11 : f32 to vector<2x8x1xf32>
    %21 = arith.addf %17, %20 : vector<2x8x1xf32>
    %22 = math.rsqrt %21 : vector<2x8x1xf32>
    %23 = vector.broadcast %22 : vector<2x8x1xf32> to vector<2x8x128xf32>
    %24 = arith.mulf %19, %23 : vector<2x8x128xf32>
    %25 = vector.shape_cast %5 : vector<1x128xf32> to vector<1x1x128xf32>
    %26 = vector.broadcast %25 : vector<1x1x128xf32> to vector<2x8x128xf32>
    %27 = arith.mulf %24, %26 : vector<2x8x128xf32>
    %28 = vector.shape_cast %6 : vector<1x128xf32> to vector<1x1x128xf32>
    %29 = vector.broadcast %28 : vector<1x1x128xf32> to vector<2x8x128xf32>
    %30 = arith.addf %27, %29 : vector<2x8x128xf32>
    %31 = arith.truncf %30 : vector<2x8x128xf32> to vector<2x8x128xbf16>
    %c0_12 = arith.constant 0 : index
    %c0_13 = arith.constant 0 : index
    %c0_14 = arith.constant 0 : index
    %32 = vector.load %arg5[%c0_12, %c0_13, %c0_14] : memref<2x8x128xbf16, #tpu.memory_space<vmem>>, vector<2x8x128xbf16>
    tpu.vector_store %arg5[%c0_12, %c0_13, %c0_14], %31 {strides = array<i32>} : memref<2x8x128xbf16, #tpu.memory_space<vmem>>, vector<2x8x128xbf16>,
    return
  }
  func.func @transform_0(%arg0: i32) -> (i32, i32, i32) {
    %c0_i32 = arith.constant 0 : i32
    %c0_i32_0 = arith.constant 0 : i32
    %c0_i32_1 = arith.constant 0 : i32
    return %arg0, %c0_i32, %c0_i32_0 : i32, i32, i32
  }
  func.func @transform_1(%arg0: i32) -> (i32, i32) {
    %c0_i32 = arith.constant 0 : i32
    %c0_i32_0 = arith.constant 0 : i32
    %c0_i32_1 = arith.constant 0 : i32
    return %c0_i32, %c0_i32_0 : i32, i32
  }
  func.func @transform_2(%arg0: i32) -> (i32, i32) {
    %c0_i32 = arith.constant 0 : i32
    %c0_i32_0 = arith.constant 0 : i32
    %c0_i32_1 = arith.constant 0 : i32
    return %c0_i32, %c0_i32_0 : i32, i32
  }
  func.func @transform_3(%arg0: i32) -> (i32, i32) {
    %c0_i32 = arith.constant 0 : i32
    %c0_i32_0 = arith.constant 0 : i32
    %c0_i32_1 = arith.constant 0 : i32
    return %c0_i32, %c0_i32_0 : i32, i32
  }
  func.func @transform_4(%arg0: i32) -> (i32, i32, i32) {
    %c0_i32 = arith.constant 0 : i32
    %c0_i32_0 = arith.constant 0 : i32
    %c0_i32_1 = arith.constant 0 : i32
    return %arg0, %c0_i32, %c0_i32_0 : i32, i32, i32
  }
}

</mosaic_0001>

<bundles_post_ra>
// kernel: tpu_custom_call.1
= control target key start
LH: loop header
LB: loop body
LE: loop exit
PB: predicated region body
PF: predicated region fallthrough
CT: control target
= control target key end

     0   :  { %9 = vsyncpa [#allocation3], 0  ;;  %s283_s0 = inlined_call_operand.hbm [shape: f32[2,8,128], index: 0, kind: input, shape index: {}]   ;;  %s284_s1 = inlined_call_operand.hbm [shape: f32[8,128], index: 1, kind: input, shape index: {}]   ;;  %s285_s2 = inlined_call_operand.vmem [shape: f32[1,128], index: 2, kind: input, shape index: {}]   ;;  %s286_s3 = inlined_call_operand.vmem [shape: f32[1,128], index: 3, kind: input, shape index: {}]   ;;  %s287_s4 = inlined_call_operand.hbm [shape: bf16[2,8,128], index: 4, kind: output, shape index: {}]  }
   0x1   :  { %10 = vsyncpa [#allocation6], 0 }
   0x2   :  { %11 = vsyncpa [#allocation4], 0  ;;  %s16_s17 = sshll.u32 %s283_s0, 4  ;;  %s235_s18 = smov [#allocation2]   ;;  %s17_s17 = int_to_ptr.hbm [resolvable:$true] %s16_s17 }
   0x3   :  { %s18_s19 = sshll.u32 %s235_s18, 4  ;;  %s30_s22 = sshll.u32 %s284_s1, 4  ;;  %s19_s19 = int_to_ptr.vmem [resolvable:$true] %s18_s19  ;;  %s31_s22 = int_to_ptr.hbm [resolvable:$true] %s30_s22 }
   0x4   :  { %s236_s23 = smov 128   ;;  %s237_s24 = smov 8  }
   0x5   :  { %24 = dma.hbm_to_vmem [thread:$0]  %s17_s17, 256, %s19_s19, [#allocation3], %s236_s23, %s236_s23, %s237_s24  }
   0x6   :  { %s238_s25 = smov [#allocation5]  }
   0x7   :  { %s32_s26 = sshll.u32 %s238_s25, 4  ;;  %s33_s26 = int_to_ptr.vmem [resolvable:$true] %s32_s26 }
   0x8   :  { %35 = dma.hbm_to_vmem [thread:$0]  %s31_s22, 128, %s33_s26, [#allocation6]  }
   0x9   :  { %229 = dma.done.wait [#allocation3], 256  }
   0xa   :  { %230 = vsyncadd [#allocation3], 4294967040 }
   0xb   :  { %231 = dma.done.wait [#allocation6], 128  }
   0xc   :  { %232 = vsyncadd [#allocation6], 4294967168  ;;  %v48_v0 = vld [vmem:[#allocation2] sm:$0xff]  ;;  %v50_v1 = vld [vmem:[#allocation5] sm:$0xff]  ;;  %v239_v5 = vmov 128.0   ;;  %s240_s29 = smov [#allocation7]  }
   0xd   :  { %v51_v2 = vadd.f32 %v50_v1, %v48_v0  ;;  %v49_v3 = vld [vmem:[#allocation2 + $0x8] sm:$0xff]  ;;  %151 = vrcp.f32 %v239_v5  ;;  %v149_v38 = vld [vmem:[%s285_s2] ss:$0 sm:$0xff]  ;;  %s120_s30 = sshll.u32 %s240_s29, 4  ;;  %s122_s7 = sshll.u32 %s287_s4, 4  ;;  %s121_s30 = int_to_ptr.vmem [resolvable:$true] %s120_s30  ;;  %s123_s7 = int_to_ptr.hbm [resolvable:$true] %s122_s7 }
   0xe   :  { %v52_v4 = vadd.f32 %v50_v1, %v49_v3  ;;  %v150_v44 = vld [vmem:[%s286_s3] ss:$0 sm:$0xff]  ;;  %s241_s2 = smov 64   ;;  %s242_s8 = smov 4  }
   0xf   :  { %55 = vadd.xlane.f32.xlu0 %v51_v2 }
  0x13   :  { %v152_v6 = vpop.eup %151 }
  0x14   :  { %v60_v7 = vmul.f32 128.0, %v152_v6  ;;  %vm64_vm0 = vweird.f32 %v152_v6 }
  0x16   :  { %v61_v8 = vsub.f32 1.0, %v60_v7 }
  0x17   :  { %57 = vadd.xlane.f32.xlu0 %v52_v4 }
  0x18   :  { %v62_v9 = vmul.f32 %v152_v6, %v61_v8 }
  0x1a   :  { %v63_v10 = vadd.f32 %v152_v6, %v62_v9 }
  0x1c   :  { %v65_v11 = vsel %vm64_vm0, %v152_v6, %v63_v10 }
  0x82   :  { %v56_v12 = vpop.xlane.xlu0 %55 }
  0x83   :  { %v66_v13 = vmul.f32 %v65_v11, %v56_v12 }
  0x85   :  { %v68_v14 = vsub.f32 %v51_v2, %v66_v13 }
  0x87   :  { %v70_v15 = vmul.f32 %v68_v14, %v68_v14 }
  0x89   :  { %72 = vadd.xlane.f32.xlu1 %v70_v15 }
  0x8a   :  { %v58_v16 = vpop.xlane.xlu0 %57 }
  0x8b   :  { %v67_v17 = vmul.f32 %v65_v11, %v58_v16 }
  0x8d   :  { %v69_v18 = vsub.f32 %v52_v4, %v67_v17 }
  0x8f   :  { %v71_v19 = vmul.f32 %v69_v18, %v69_v18 }
  0x91   :  { %74 = vadd.xlane.f32.xlu1 %v71_v19 }
  0xfc   :  { %v73_v20 = vpop.xlane.xlu1 %72 }
  0xfd   :  { %v76_v21 = vmul.f32 %v73_v20, %v65_v11 }
  0xff   :  { %v78_v22 = vadd.f32 1e-12, %v76_v21 }
 0x101   :  { %153 = vrsqrt.f32 %v78_v22  ;;  %vm86_vm2 = vweird.f32 %v78_v22 }
 0x104   :  { %v75_v23 = vpop.xlane.xlu1 %74 }
 0x105   :  { %v77_v24 = vmul.f32 %v75_v23, %v65_v11 }
 0x107   :  { %v154_v25 = vpop.eup %153  ;;  %v79_v26 = vadd.f32 1e-12, %v77_v24 }
 0x108   :  { %v81_v27 = vmul.f32 %v154_v25, %v78_v22  ;;  %vm87_vm1 = vweird.f32 %v154_v25 }
 0x109   :  { %155 = vrsqrt.f32 %v79_v26  ;;  %vm88_vm3 = vmor %vm86_vm2, %vm87_vm1  ;;  %vm96_vm5 = vweird.f32 %v79_v26 }
 0x10a   :  { %v82_v28 = vmul.f32 %v154_v25, %v81_v27 }
 0x10c   :  { %v83_v29 = vmul.f32 0.5, %v82_v28 }
 0x10e   :  { %v84_v30 = vsub.f32 1.5, %v83_v29 }
 0x10f   :  { %v156_v31 = vpop.eup %155 }
 0x110   :  { %v85_v32 = vmul.f32 %v154_v25, %v84_v30  ;;  %v91_v33 = vmul.f32 %v156_v31, %v79_v26  ;;  %vm97_vm4 = vweird.f32 %v156_v31 }
 0x111   :  { %vm98_vm6 = vmor %vm96_vm5, %vm97_vm4 }
 0x112   :  { %v92_v34 = vmul.f32 %v156_v31, %v91_v33  ;;  %v89_v35 = vsel %vm88_vm3, %v154_v25, %v85_v32 }
 0x113   :  { %v100_v39 = vmul.f32 %v89_v35, %v68_v14 }
 0x114   :  { %v93_v36 = vmul.f32 0.5, %v92_v34 }
 0x115   :  { %v105_v42 = vmul.f32 %v149_v38, %v100_v39 }
 0x116   :  { %v94_v37 = vsub.f32 1.5, %v93_v36 }
 0x117   :  { %v110_v46 = vadd.f32 %v150_v44, %v105_v42 }
 0x118   :  { %v95_v40 = vmul.f32 %v156_v31, %v94_v37 }
 0x11a   :  { %v99_v41 = vsel %vm98_vm6, %v156_v31, %v95_v40 }
 0x11b   :  { %v101_v43 = vmul.f32 %v99_v41, %v69_v18 }
 0x11d   :  { %v106_v45 = vmul.f32 %v149_v38, %v101_v43 }
 0x11f   :  { %v111_v47 = vadd.f32 %v150_v44, %v106_v45 }
 0x121   :  { %v139_v48 = vpack.c.bf16 %v111_v47, %v110_v46 }
 0x123   :  { %140 = vst [vmem:[#allocation7] sm:$0xff] %v139_v48  }
 0x124   :  { %128 = dma.vmem_to_hbm [thread:$0]  %s121_s30, 128, %s123_s7, [#allocation4], %s241_s2, %s241_s2, %s242_s8  }
 0x125   :  { %233 = dma.done.wait [#allocation4], 128  }
 0x126   :  { %234 = vsyncadd [#allocation4], 4294967168 }
 0x127   :  { %133 = vsyncpa [#allocation3], 1 }
 0x128   :  { %134 = vsyncpa [#allocation6], 1 }
 0x129   :  { %135 = vsyncpa [#allocation4], 1 }

</bundles_post_ra>
